<compile_context>
chip_gen: v6e
topology: v6e:2x2x1
jax: 0.10.0
libtpu: 0.0.40
codegen_flags: <defaults>
</compile_context>

<pallas_src>
import functools

import jax
import jax.numpy as jnp
from jax import lax
from jax.experimental import pallas as pl
from jax.experimental.pallas import tpu as pltpu


def _dice_sums_kernel(x_ref, y_ref, inter_ref, xs_ref, ys_ref,
                      *, n_total, tile_n, tiles_per_split):
    p = pl.program_id(0)   # reduction split (parallel axis; feeds 2 TCs on v7x)
    t = pl.program_id(1)   # lane-tile index within the split (arbitrary axis)

    # Output blocks are resident across the whole 't' axis (their block index
    # only depends on p) -> use them as accumulators; zero on each split's
    # first step.
    @pl.when(t == 0)
    def _():
        inter_ref[...] = jnp.zeros_like(inter_ref)
        xs_ref[...] = jnp.zeros_like(xs_ref)
        ys_ref[...] = jnp.zeros_like(ys_ref)

    g = p * tiles_per_split + t   # global lane-tile index
    base = g * tile_n             # first global lane covered by this tile

    def _accum(x, y):
        x = x.astype(jnp.float32)
        y = y.astype(jnp.float32)
        inter_ref[...] += jnp.sum(x * y, axis=1, keepdims=True)
        xs_ref[...] += jnp.sum(x, axis=1, keepdims=True)
        ys_ref[...] += jnp.sum(y, axis=1, keepdims=True)

    # Hot path: fully in-bounds tile, no masking cost.
    @pl.when(base + tile_n <= n_total)
    def _():
        _accum(x_ref[...], y_ref[...])

    # Ragged last tile: mask out-of-range lanes (their VMEM contents are
    # undefined since Pallas does not zero-fill partial edge blocks).
    @pl.when(jnp.logical_and(base < n_total, base + tile_n > n_total))
    def _():
        lane = lax.broadcasted_iota(jnp.int32, x_ref.shape, 1)
        valid = lane < (n_total - base)
        x = jnp.where(valid, x_ref[...].astype(jnp.float32), 0.0)
        y = jnp.where(valid, y_ref[...].astype(jnp.float32), 0.0)
        _accum(x, y)
    # Tiles entirely past N (padding of an uneven split) add nothing.


def dice_loss(recon_label_maps, label_maps, epsilon=1e-6, *,
              vmem_buffer_budget_bytes=32 * 1024 * 1024):
    """Pallas implementation of the Dice module forward pass.

    recon_label_maps, label_maps: (B, C, H, W, D) arrays. Returns scalar f32.
    """
    assert recon_label_maps.shape == label_maps.shape
    B, C, H, W, D = recon_label_maps.shape
    M = B * C
    N = H * W * D

    # Metadata-only reshapes; native dtypes are streamed (kernel casts tiles
    # to f32 on the fly) -> no extra HBM passes for astype/pad.
    x = recon_label_maps.reshape(M, N)
    y = label_maps.reshape(M, N)

    # Size the lane tile so (2 inputs x 2 pipeline buffers) fit the VMEM budget.
    bytes_per_lane = 2 * M * (x.dtype.itemsize + y.dtype.itemsize)
    tile_n = (vmem_buffer_budget_bytes // bytes_per_lane) // 128 * 128
    tile_n = max(128, tile_n)
    tile_n = min(tile_n, pl.cdiv(N, 128) * 128)   # never bigger than padded N

    n_tiles = pl.cdiv(N, tile_n)
    num_splits = 2 if n_tiles >= 2 else 1          # both TensorCores on v7x
    tiles_per_split = pl.cdiv(n_tiles, num_splits)

    kernel = functools.partial(
        _dice_sums_kernel,
        n_total=N, tile_n=tile_n, tiles_per_split=tiles_per_split)

    def in_map(p, t):
        # Clamp so padded steps of an uneven split remain a legal edge block;
        # the kernel skips their contribution via the `base >= N` guard.
        return (0, jnp.minimum(p * tiles_per_split + t, n_tiles - 1))

    out_spec = pl.BlockSpec((None, M, 1), lambda p, t: (p, 0, 0))
    out_sds = jax.ShapeDtypeStruct((num_splits, M, 1), jnp.float32)

    total_bytes = M * N * (x.dtype.itemsize + y.dtype.itemsize)
    inter, xs, ys = pl.pallas_call(
        kernel,
        out_shape=(out_sds, out_sds, out_sds),
        grid_spec=pltpu.PrefetchScalarGridSpec(
            num_scalar_prefetch=0,
            grid=(num_splits, tiles_per_split),
            in_specs=[pl.BlockSpec((M, tile_n), in_map),
                      pl.BlockSpec((M, tile_n), in_map)],
            out_specs=(out_spec, out_spec, out_spec),
        ),
        compiler_params=pltpu.CompilerParams(
            dimension_semantics=("parallel", "arbitrary"),
            vmem_limit_bytes=48 * 1024 * 1024,
        ),
        cost_estimate=pl.CostEstimate(
            flops=4 * M * N,
            transcendentals=0,
            bytes_accessed=total_bytes),
    )(x, y)

    # Tiny O(M) epilogue in plain JAX: combine per-split partials, then
    # dice / non-empty mask / mean — mirrors the PyTorch module exactly.
    inter = jnp.sum(inter, axis=0)[:, 0]
    xs = jnp.sum(xs, axis=0)[:, 0]
    ys = jnp.sum(ys, axis=0)[:, 0]
    dice = 2.0 * inter / (xs + ys + jnp.float32(epsilon))
    nonempty = ys > 0.0
    cnt = jnp.sum(nonempty.astype(jnp.float32))
    num = jnp.sum(jnp.where(nonempty, dice, 0.0))
    # If every class is empty -> 0.0, else 1 - mean(dice over non-empty).
    return jnp.where(cnt > 0.0, 1.0 - num / jnp.maximum(cnt, 1.0),
                     jnp.float32(0.0))


def _dice_loss_ref(recon, target, epsilon=1e-6):
    """Pure-JAX reference mirroring the PyTorch module."""
    recon = recon.astype(jnp.float32)
    target = target.astype(jnp.float32)
    inter = jnp.sum(recon * target, axis=(2, 3, 4))
    rsum = jnp.sum(recon, axis=(2, 3, 4))
    tsum = jnp.sum(target, axis=(2, 3, 4))
    dice = 2.0 * inter / (rsum + tsum + epsilon)
    mask = tsum > 0
    cnt = jnp.sum(mask.astype(jnp.float32))
    num = jnp.sum(jnp.where(mask, dice, 0.0))
    return jnp.where(cnt > 0, 1.0 - num / jnp.maximum(cnt, 1.0), 0.0)


if __name__ == "__main__":
    key = jax.random.PRNGKey(0)
    k1, k2 = jax.random.split(key)

    B, C, H, W, D = 2, 4, 16, 16, 8
    # Soft "reconstructed" label maps (per-voxel class probabilities).
    recon = jax.nn.softmax(jax.random.normal(k1, (B, C, H, W, D)), axis=1)
    # One-hot ground-truth label maps.
    labels = jax.random.randint(k2, (B, H, W, D), 0, C)
    one_hot = jax.nn.one_hot(labels, C, axis=1, dtype=jnp.float32)

    out = dice_loss(recon, one_hot)
    out = jax.block_until_ready(out)

    ref = _dice_loss_ref(recon, one_hot)
    assert jnp.allclose(out, ref, atol=1e-5, rtol=1e-5), (out, ref)

    print("KERNEL_OK")
</pallas_src>

<mosaic_0001>
module attributes {stable_mosaic.version = 11 : i64} {
  func.func @_dice_sums_kernel(%arg0: i32, %arg1: i32, %arg2: memref<8x2048xf32, #tpu.memory_space<vmem>>, %arg3: memref<8x2048xf32, #tpu.memory_space<vmem>>, %arg4: memref<1x8x1xf32, #tpu.memory_space<vmem>>, %arg5: memref<1x8x1xf32, #tpu.memory_space<vmem>>, %arg6: memref<1x8x1xf32, #tpu.memory_space<vmem>>) attributes {dimension_semantics = [#tpu.dimension_semantics<parallel>, #tpu.dimension_semantics<arbitrary>], iteration_bounds = array<i64: 1, 1>, scalar_prefetch = 0 : i64, scratch_operands = 0 : i64, tpu.core_type = #tpu.core_type<tc>, window_params = [{transform_indices = @transform_0, window_bounds = array<i64: 8, 2048>}, {transform_indices = @transform_1, window_bounds = array<i64: 8, 2048>}, {transform_indices = @transform_2, window_bounds = array<i64: 1, 8, 1>}, {transform_indices = @transform_3, window_bounds = array<i64: 1, 8, 1>}, {transform_indices = @transform_4, window_bounds = array<i64: 1, 8, 1>}]} {
    %c0_i32 = arith.constant 0 : i32
    %0 = arith.cmpi eq, %arg1, %c0_i32 : i32
    %1 = arith.extui %0 : i1 to i32
    %c0_i32_0 = arith.constant 0 : i32
    %2 = arith.cmpi ne, %1, %c0_i32_0 : i32
    scf.if %2 {
      %cst = arith.constant 0.000000e+00 : f32
      %16 = vector.broadcast %cst : f32 to vector<8x1xf32>
      %c0 = arith.constant 0 : index
      %c0_8 = arith.constant 0 : index
      %c0_9 = arith.constant 0 : index
      %17 = vector.load %arg4[%c0, %c0_8, %c0_9] : memref<1x8x1xf32, #tpu.memory_space<vmem>>, vector<1x8x1xf32>
      %18 = vector.shape_cast %17 : vector<1x8x1xf32> to vector<8x1xf32>
      %19 = vector.shape_cast %16 : vector<8x1xf32> to vector<1x8x1xf32>
      tpu.vector_store %arg4[%c0, %c0_8, %c0_9], %19 {strides = array<i32>} : memref<1x8x1xf32, #tpu.memory_space<vmem>>, vector<1x8x1xf32>,
      %cst_10 = arith.constant 0.000000e+00 : f32
      %20 = vector.broadcast %cst_10 : f32 to vector<8x1xf32>
      %c0_11 = arith.constant 0 : index
      %c0_12 = arith.constant 0 : index
      %c0_13 = arith.constant 0 : index
      %21 = vector.load %arg5[%c0_11, %c0_12, %c0_13] : memref<1x8x1xf32, #tpu.memory_space<vmem>>, vector<1x8x1xf32>
      %22 = vector.shape_cast %21 : vector<1x8x1xf32> to vector<8x1xf32>
      %23 = vector.shape_cast %20 : vector<8x1xf32> to vector<1x8x1xf32>
      tpu.vector_store %arg5[%c0_11, %c0_12, %c0_13], %23 {strides = array<i32>} : memref<1x8x1xf32, #tpu.memory_space<vmem>>, vector<1x8x1xf32>,
      %cst_14 = arith.constant 0.000000e+00 : f32
      %24 = vector.broadcast %cst_14 : f32 to vector<8x1xf32>
      %c0_15 = arith.constant 0 : index
      %c0_16 = arith.constant 0 : index
      %c0_17 = arith.constant 0 : index
      %25 = vector.load %arg6[%c0_15, %c0_16, %c0_17] : memref<1x8x1xf32, #tpu.memory_space<vmem>>, vector<1x8x1xf32>
      %26 = vector.shape_cast %25 : vector<1x8x1xf32> to vector<8x1xf32>
      %27 = vector.shape_cast %24 : vector<8x1xf32> to vector<1x8x1xf32>
      tpu.vector_store %arg6[%c0_15, %c0_16, %c0_17], %27 {strides = array<i32>} : memref<1x8x1xf32, #tpu.memory_space<vmem>>, vector<1x8x1xf32>,
    } else {
    }
    %c1_i32 = arith.constant 1 : i32
    %3 = arith.muli %arg0, %c1_i32 : i32
    %4 = arith.addi %3, %arg1 : i32
    %c2048_i32 = arith.constant 2048 : i32
    %5 = arith.muli %4, %c2048_i32 : i32
    %c2048_i32_1 = arith.constant 2048 : i32
    %6 = arith.addi %5, %c2048_i32_1 : i32
    %c2048_i32_2 = arith.constant 2048 : i32
    %7 = arith.cmpi sle, %6, %c2048_i32_2 : i32
    %8 = arith.extui %7 : i1 to i32
    %c0_i32_3 = arith.constant 0 : i32
    %9 = arith.cmpi ne, %8, %c0_i32_3 : i32
    scf.if %9 {
      %c0 = arith.constant 0 : index
      %c0_8 = arith.constant 0 : index
      %16 = vector.load %arg2[%c0, %c0_8] : memref<8x2048xf32, #tpu.memory_space<vmem>>, vector<8x2048xf32>
      %c0_9 = arith.constant 0 : index
      %c0_10 = arith.constant 0 : index
      %17 = vector.load %arg3[%c0_9, %c0_10] : memref<8x2048xf32, #tpu.memory_space<vmem>>, vector<8x2048xf32>
      %c0_11 = arith.constant 0 : index
      %c0_12 = arith.constant 0 : index
      %c0_13 = arith.constant 0 : index
      %18 = vector.load %arg4[%c0_11, %c0_12, %c0_13] : memref<1x8x1xf32, #tpu.memory_space<vmem>>, vector<1x8x1xf32>
      %19 = vector.shape_cast %18 : vector<1x8x1xf32> to vector<8x1xf32>
      %20 = arith.mulf %16, %17 : vector<8x2048xf32>
      %cst = arith.constant dense<0.000000e+00> : vector<8xf32>
      %21 = vector.multi_reduction <add>, %20, %cst [1] : vector<8x2048xf32> to vector<8xf32>
      %22 = vector.shape_cast %21 : vector<8xf32> to vector<8x1xf32>
      %23 = arith.addf %19, %22 : vector<8x1xf32>
      %c0_14 = arith.constant 0 : index
      %c0_15 = arith.constant 0 : index
      %c0_16 = arith.constant 0 : index
      %24 = vector.load %arg4[%c0_14, %c0_15, %c0_16] : memref<1x8x1xf32, #tpu.memory_space<vmem>>, vector<1x8x1xf32>
      %25 = vector.shape_cast %24 : vector<1x8x1xf32> to vector<8x1xf32>
      %26 = vector.shape_cast %23 : vector<8x1xf32> to vector<1x8x1xf32>
      tpu.vector_store %arg4[%c0_14, %c0_15, %c0_16], %26 {strides = array<i32>} : memref<1x8x1xf32, #tpu.memory_space<vmem>>, vector<1x8x1xf32>,
      %c0_17 = arith.constant 0 : index
      %c0_18 = arith.constant 0 : index
      %c0_19 = arith.constant 0 : index
      %27 = vector.load %arg5[%c0_17, %c0_18, %c0_19] : memref<1x8x1xf32, #tpu.memory_space<vmem>>, vector<1x8x1xf32>
      %28 = vector.shape_cast %27 : vector<1x8x1xf32> to vector<8x1xf32>
      %cst_20 = arith.constant dense<0.000000e+00> : vector<8xf32>
      %29 = vector.multi_reduction <add>, %16, %cst_20 [1] : vector<8x2048xf32> to vector<8xf32>
      %30 = vector.shape_cast %29 : vector<8xf32> to vector<8x1xf32>
      %31 = arith.addf %28, %30 : vector<8x1xf32>
      %c0_21 = arith.constant 0 : index
      %c0_22 = arith.constant 0 : index
      %c0_23 = arith.constant 0 : index
      %32 = vector.load %arg5[%c0_21, %c0_22, %c0_23] : memref<1x8x1xf32, #tpu.memory_space<vmem>>, vector<1x8x1xf32>
      %33 = vector.shape_cast %32 : vector<1x8x1xf32> to vector<8x1xf32>
      %34 = vector.shape_cast %31 : vector<8x1xf32> to vector<1x8x1xf32>
      tpu.vector_store %arg5[%c0_21, %c0_22, %c0_23], %34 {strides = array<i32>} : memref<1x8x1xf32, #tpu.memory_space<vmem>>, vector<1x8x1xf32>,
      %c0_24 = arith.constant 0 : index
      %c0_25 = arith.constant 0 : index
      %c0_26 = arith.constant 0 : index
      %35 = vector.load %arg6[%c0_24, %c0_25, %c0_26] : memref<1x8x1xf32, #tpu.memory_space<vmem>>, vector<1x8x1xf32>
      %36 = vector.shape_cast %35 : vector<1x8x1xf32> to vector<8x1xf32>
      %cst_27 = arith.constant dense<0.000000e+00> : vector<8xf32>
      %37 = vector.multi_reduction <add>, %17, %cst_27 [1] : vector<8x2048xf32> to vector<8xf32>
      %38 = vector.shape_cast %37 : vector<8xf32> to vector<8x1xf32>
      %39 = arith.addf %36, %38 : vector<8x1xf32>
      %c0_28 = arith.constant 0 : index
      %c0_29 = arith.constant 0 : index
      %c0_30 = arith.constant 0 : index
      %40 = vector.load %arg6[%c0_28, %c0_29, %c0_30] : memref<1x8x1xf32, #tpu.memory_space<vmem>>, vector<1x8x1xf32>
      %41 = vector.shape_cast %40 : vector<1x8x1xf32> to vector<8x1xf32>
      %42 = vector.shape_cast %39 : vector<8x1xf32> to vector<1x8x1xf32>
      tpu.vector_store %arg6[%c0_28, %c0_29, %c0_30], %42 {strides = array<i32>} : memref<1x8x1xf32, #tpu.memory_space<vmem>>, vector<1x8x1xf32>,
    } else {
    }
    %c2048_i32_4 = arith.constant 2048 : i32
    %10 = arith.cmpi slt, %5, %c2048_i32_4 : i32
    %c2048_i32_5 = arith.constant 2048 : i32
    %11 = arith.addi %5, %c2048_i32_5 : i32
    %c2048_i32_6 = arith.constant 2048 : i32
    %12 = arith.cmpi sgt, %11, %c2048_i32_6 : i32
    %13 = arith.andi %10, %12 : i1
    %14 = arith.extui %13 : i1 to i32
    %c0_i32_7 = arith.constant 0 : i32
    %15 = arith.cmpi ne, %14, %c0_i32_7 : i32
    scf.if %15 {
      %16 = tpu.iota {dimensions = array<i32: 1>} : vector<8x2048xi32>
      %c2048_i32_8 = arith.constant 2048 : i32
      %17 = arith.subi %c2048_i32_8, %5 : i32
      %18 = vector.broadcast %17 : i32 to vector<8x2048xi32>
      %19 = arith.cmpi slt, %16, %18 : vector<8x2048xi32>
      %c0 = arith.constant 0 : index
      %c0_9 = arith.constant 0 : index
      %20 = vector.load %arg2[%c0, %c0_9] : memref<8x2048xf32, #tpu.memory_space<vmem>>, vector<8x2048xf32>
      %cst = arith.constant 0.000000e+00 : f32
      %21 = vector.broadcast %cst : f32 to vector<8x2048xf32>
      %22 = arith.select %19, %20, %21 : vector<8x2048xi1>, vector<8x2048xf32>
      %c0_10 = arith.constant 0 : index
      %c0_11 = arith.constant 0 : index
      %23 = vector.load %arg3[%c0_10, %c0_11] : memref<8x2048xf32, #tpu.memory_space<vmem>>, vector<8x2048xf32>
      %cst_12 = arith.constant 0.000000e+00 : f32
      %24 = vector.broadcast %cst_12 : f32 to vector<8x2048xf32>
      %25 = arith.select %19, %23, %24 : vector<8x2048xi1>, vector<8x2048xf32>
      %c0_13 = arith.constant 0 : index
      %c0_14 = arith.constant 0 : index
      %c0_15 = arith.constant 0 : index
      %26 = vector.load %arg4[%c0_13, %c0_14, %c0_15] : memref<1x8x1xf32, #tpu.memory_space<vmem>>, vector<1x8x1xf32>
      %27 = vector.shape_cast %26 : vector<1x8x1xf32> to vector<8x1xf32>
      %28 = arith.mulf %22, %25 : vector<8x2048xf32>
      %cst_16 = arith.constant dense<0.000000e+00> : vector<8xf32>
      %29 = vector.multi_reduction <add>, %28, %cst_16 [1] : vector<8x2048xf32> to vector<8xf32>
      %30 = vector.shape_cast %29 : vector<8xf32> to vector<8x1xf32>
      %31 = arith.addf %27, %30 : vector<8x1xf32>
      %c0_17 = arith.constant 0 : index
      %c0_18 = arith.constant 0 : index
      %c0_19 = arith.constant 0 : index
      %32 = vector.load %arg4[%c0_17, %c0_18, %c0_19] : memref<1x8x1xf32, #tpu.memory_space<vmem>>, vector<1x8x1xf32>
      %33 = vector.shape_cast %32 : vector<1x8x1xf32> to vector<8x1xf32>
      %34 = vector.shape_cast %31 : vector<8x1xf32> to vector<1x8x1xf32>
      tpu.vector_store %arg4[%c0_17, %c0_18, %c0_19], %34 {strides = array<i32>} : memref<1x8x1xf32, #tpu.memory_space<vmem>>, vector<1x8x1xf32>,
      %c0_20 = arith.constant 0 : index
      %c0_21 = arith.constant 0 : index
      %c0_22 = arith.constant 0 : index
      %35 = vector.load %arg5[%c0_20, %c0_21, %c0_22] : memref<1x8x1xf32, #tpu.memory_space<vmem>>, vector<1x8x1xf32>
      %36 = vector.shape_cast %35 : vector<1x8x1xf32> to vector<8x1xf32>
      %cst_23 = arith.constant dense<0.000000e+00> : vector<8xf32>
      %37 = vector.multi_reduction <add>, %22, %cst_23 [1] : vector<8x2048xf32> to vector<8xf32>
      %38 = vector.shape_cast %37 : vector<8xf32> to vector<8x1xf32>
      %39 = arith.addf %36, %38 : vector<8x1xf32>
      %c0_24 = arith.constant 0 : index
      %c0_25 = arith.constant 0 : index
      %c0_26 = arith.constant 0 : index
      %40 = vector.load %arg5[%c0_24, %c0_25, %c0_26] : memref<1x8x1xf32, #tpu.memory_space<vmem>>, vector<1x8x1xf32>
      %41 = vector.shape_cast %40 : vector<1x8x1xf32> to vector<8x1xf32>
      %42 = vector.shape_cast %39 : vector<8x1xf32> to vector<1x8x1xf32>
      tpu.vector_store %arg5[%c0_24, %c0_25, %c0_26], %42 {strides = array<i32>} : memref<1x8x1xf32, #tpu.memory_space<vmem>>, vector<1x8x1xf32>,
      %c0_27 = arith.constant 0 : index
      %c0_28 = arith.constant 0 : index
      %c0_29 = arith.constant 0 : index
      %43 = vector.load %arg6[%c0_27, %c0_28, %c0_29] : memref<1x8x1xf32, #tpu.memory_space<vmem>>, vector<1x8x1xf32>
      %44 = vector.shape_cast %43 : vector<1x8x1xf32> to vector<8x1xf32>
      %cst_30 = arith.constant dense<0.000000e+00> : vector<8xf32>
      %45 = vector.multi_reduction <add>, %25, %cst_30 [1] : vector<8x2048xf32> to vector<8xf32>
      %46 = vector.shape_cast %45 : vector<8xf32> to vector<8x1xf32>
      %47 = arith.addf %44, %46 : vector<8x1xf32>
      %c0_31 = arith.constant 0 : index
      %c0_32 = arith.constant 0 : index
      %c0_33 = arith.constant 0 : index
      %48 = vector.load %arg6[%c0_31, %c0_32, %c0_33] : memref<1x8x1xf32, #tpu.memory_space<vmem>>, vector<1x8x1xf32>
      %49 = vector.shape_cast %48 : vector<1x8x1xf32> to vector<8x1xf32>
      %50 = vector.shape_cast %47 : vector<8x1xf32> to vector<1x8x1xf32>
      tpu.vector_store %arg6[%c0_31, %c0_32, %c0_33], %50 {strides = array<i32>} : memref<1x8x1xf32, #tpu.memory_space<vmem>>, vector<1x8x1xf32>,
    } else {
    }
    return
  }
  func.func @transform_0(%arg0: i32, %arg1: i32) -> (i32, i32) {
    %c1_i32 = arith.constant 1 : i32
    %0 = arith.muli %arg0, %c1_i32 : i32
    %1 = arith.addi %0, %arg1 : i32
    %c0_i32 = arith.constant 0 : i32
    %2 = arith.minsi %1, %c0_i32 : i32
    %c0_i32_0 = arith.constant 0 : i32
    %c0_i32_1 = arith.constant 0 : i32
    return %c0_i32_0, %2 : i32, i32
  }
  func.func @transform_1(%arg0: i32, %arg1: i32) -> (i32, i32) {
    %c1_i32 = arith.constant 1 : i32
    %0 = arith.muli %arg0, %c1_i32 : i32
    %1 = arith.addi %0, %arg1 : i32
    %c0_i32 = arith.constant 0 : i32
    %2 = arith.minsi %1, %c0_i32 : i32
    %c0_i32_0 = arith.constant 0 : i32
    %c0_i32_1 = arith.constant 0 : i32
    return %c0_i32_0, %2 : i32, i32
  }
  func.func @transform_2(%arg0: i32, %arg1: i32) -> (i32, i32, i32) {
    %c0_i32 = arith.constant 0 : i32
    %c0_i32_0 = arith.constant 0 : i32
    %c0_i32_1 = arith.constant 0 : i32
    return %arg0, %c0_i32, %c0_i32_0 : i32, i32, i32
  }
  func.func @transform_3(%arg0: i32, %arg1: i32) -> (i32, i32, i32) {
    %c0_i32 = arith.constant 0 : i32
    %c0_i32_0 = arith.constant 0 : i32
    %c0_i32_1 = arith.constant 0 : i32
    return %arg0, %c0_i32, %c0_i32_0 : i32, i32, i32
  }
  func.func @transform_4(%arg0: i32, %arg1: i32) -> (i32, i32, i32) {
    %c0_i32 = arith.constant 0 : i32
    %c0_i32_0 = arith.constant 0 : i32
    %c0_i32_1 = arith.constant 0 : i32
    return %arg0, %c0_i32, %c0_i32_0 : i32, i32, i32
  }
}

</mosaic_0001>

<bundles_post_ra>
// kernel: tpu_custom_call.1
= control target key start
LH: loop header
LB: loop body
LE: loop exit
PB: predicated region body
PF: predicated region fallthrough
CT: control target
= control target key end

     0   :  { %10 = vsyncpa [#allocation3], 0  ;;  %s496_s0 = inlined_call_operand.hbm [shape: f32[8,2048], index: 0, kind: input, shape index: {}]   ;;  %s497_s1 = inlined_call_operand.hbm [shape: f32[8,2048], index: 1, kind: input, shape index: {}]   ;;  %s498_s2 = inlined_call_operand.vmem [shape: f32[1,8,1], index: 2, kind: output, shape index: {0}]   ;;  %s499_s3 = inlined_call_operand.vmem [shape: f32[1,8,1], index: 3, kind: output, shape index: {1}]   ;;  %s500_s4 = inlined_call_operand.vmem [shape: f32[1,8,1], index: 4, kind: output, shape index: {2}]  }
   0x1   :  { %11 = vsyncpa [#allocation5], 0  ;;  %s429_s15 = smov [#allocation2]   ;;  %s430_s17 = smov [#allocation4]  }
   0x2   :  { %s24_s16 = sshll.u32 %s429_s15, 4  ;;  %s40_s18 = sshll.u32 %s430_s17, 4  ;;  %s25_s16 = int_to_ptr.vmem [resolvable:$true] %s24_s16  ;;  %s41_s18 = int_to_ptr.vmem [resolvable:$true] %s40_s18 }
   0x3   :  { %s393_s19 = scalar_lea.vmem %s25_s16, 2048  ;;  %p398_p1 = scmp.lt.s32.totalorder %s25_s16, %s25_s16 }
   0x4   :  { %p394_p0 = scmp.ne.s32.totalorder %s25_s16, %s393_s19  ;;  %p399_p2 = scmp.lt.s32.totalorder %s393_s19, %s393_s19 }
   0x6   :  { %p400_p3 = por %p399_p2, %p398_p1 }
   0x8   :  { %p401_p4 = pnand %p400_p3, %p394_p0 }
   0xa   :  { %404 = shalt.err (!%p401_p4)
}
   0xb   :  { %27 = dma.hbm_to_vmem [thread:$0]  %s496_s0, 2048, %s25_s16, [#allocation3]  }
   0xc   :  { %s413_s22 = scalar_lea.vmem %s41_s18, 2048  ;;  %p418_p6 = scmp.lt.s32.totalorder %s41_s18, %s41_s18 }
   0xd   :  { %p414_p5 = scmp.ne.s32.totalorder %s41_s18, %s413_s22  ;;  %p419_p7 = scmp.lt.s32.totalorder %s413_s22, %s413_s22 }
   0xf   :  { %p420_p8 = por %p419_p7, %p418_p6 }
  0x11   :  { %p421_p9 = pnand %p420_p8, %p414_p5 }
  0x13   :  { %424 = shalt.err (!%p421_p9)
}
  0x14   :  { %43 = dma.hbm_to_vmem [thread:$0]  %s497_s1, 2048, %s41_s18, [#allocation5]  }
  0x15   :  { %425 = dma.done.wait [#allocation3], 2048  }
  0x16   :  { %426 = vsyncadd [#allocation3], 4294965248 }
  0x17   :  { %427 = dma.done.wait [#allocation5], 2048  }
  0x18   :  { %428 = vsyncadd [#allocation5], 4294965248  ;;  %vm62_vm0 = vcmask 7168   ;;  %v431_v0 = vmov 0.0   ;;  %v73_v1 = vld [vmem:[#allocation2] sm:$0xff]  ;;  %v74_v2 = vld [vmem:[#allocation2 + $0x8] sm:$0xff] }
  0x19   :  { %63 = vst.msk [vmem:[%s498_s2] sm:$0xff] %vm62_vm0, %v431_v0  ;;  %64 = vst.msk [vmem:[%s499_s3] sm:$0xff] %vm62_vm0, %v431_v0  ;;  %v143_v3 = vadd.f32 %v74_v2, %v73_v1  ;;  %v75_v4 = vld [vmem:[#allocation2 + $0x10] sm:$0xff]  ;;  %v76_v6 = vld [vmem:[#allocation2 + $0x18] sm:$0xff] }
  0x1a   :  { %65 = vst.msk [vmem:[%s500_s4] sm:$0xff] %vm62_vm0, %v431_v0  ;;  %v89_v7 = vld [vmem:[#allocation4] sm:$0xff]  ;;  %v90_v8 = vld [vmem:[#allocation4 + $0x8] sm:$0xff]  ;;  %v91_v11 = vld [vmem:[#allocation4 + $0x10] sm:$0xff] }
  0x1b   :  { %v144_v5 = vadd.f32 %v143_v3, %v75_v4  ;;  %v77_v10 = vld [vmem:[#allocation2 + $0x20] sm:$0xff]  ;;  %v92_v12 = vld [vmem:[#allocation4 + $0x18] sm:$0xff]  ;;  %v106_v13 = vmul.f32 %v89_v7, %v73_v1  ;;  %v107_v14 = vmul.f32 %v90_v8, %v74_v2  ;;  %v163_v15 = vadd.f32 %v90_v8, %v89_v7  ;;  %v78_v21 = vld [vmem:[#allocation2 + $0x28] sm:$0xff] }
  0x1c   :  { %v93_v16 = vld [vmem:[#allocation4 + $0x20] sm:$0xff]  ;;  %v108_v17 = vmul.f32 %v91_v11, %v75_v4  ;;  %v109_v19 = vmul.f32 %v92_v12, %v76_v6  ;;  %v94_v22 = vld [vmem:[#allocation4 + $0x28] sm:$0xff]  ;;  %v79_v26 = vld [vmem:[#allocation2 + $0x30] sm:$0xff] }
  0x1d   :  { %v145_v9 = vadd.f32 %v144_v5, %v76_v6  ;;  %v122_v20 = vadd.f32 %v107_v14, %v106_v13  ;;  %v164_v23 = vadd.f32 %v163_v15, %v91_v11  ;;  %v110_v24 = vmul.f32 %v93_v16, %v77_v10  ;;  %v95_v27 = vld [vmem:[#allocation4 + $0x30] sm:$0xff]  ;;  %v80_v32 = vld [vmem:[#allocation2 + $0x38] sm:$0xff]  ;;  %v81_v38 = vld [vmem:[#allocation2 + $0x40] sm:$0xff] }
  0x1e   :  { %v111_v30 = vmul.f32 %v94_v22, %v78_v21  ;;  %v96_v33 = vld [vmem:[#allocation4 + $0x38] sm:$0xff]  ;;  %v112_v36 = vmul.f32 %v95_v27, %v79_v26  ;;  %v97_v39 = vld [vmem:[#allocation4 + $0x40] sm:$0xff]  ;;  %v82_v44 = vld [vmem:[#allocation2 + $0x48] sm:$0xff] }
  0x1f   :  { %v146_v18 = vadd.f32 %v145_v9, %v77_v10  ;;  %v123_v25 = vadd.f32 %v122_v20, %v108_v17  ;;  %v165_v28 = vadd.f32 %v164_v23, %v92_v12  ;;  %v113_v42 = vmul.f32 %v96_v33, %v80_v32  ;;  %v98_v45 = vld [vmem:[#allocation4 + $0x48] sm:$0xff]  ;;  %v83_v50 = vld [vmem:[#allocation2 + $0x50] sm:$0xff]  ;;  %v84_v56 = vld [vmem:[#allocation2 + $0x58] sm:$0xff] }
  0x20   :  { %v114_v48 = vmul.f32 %v97_v39, %v81_v38  ;;  %v99_v51 = vld [vmem:[#allocation4 + $0x50] sm:$0xff]  ;;  %v115_v54 = vmul.f32 %v98_v45, %v82_v44  ;;  %v100_v57 = vld [vmem:[#allocation4 + $0x58] sm:$0xff]  ;;  %v85_v62 = vld [vmem:[#allocation2 + $0x60] sm:$0xff] }
  0x21   :  { %v147_v29 = vadd.f32 %v146_v18, %v78_v21  ;;  %v124_v31 = vadd.f32 %v123_v25, %v109_v19  ;;  %v166_v34 = vadd.f32 %v165_v28, %v93_v16  ;;  %v116_v60 = vmul.f32 %v99_v51, %v83_v50  ;;  %v101_v63 = vld [vmem:[#allocation4 + $0x60] sm:$0xff]  ;;  %v86_v4 = vld [vmem:[#allocation2 + $0x68] sm:$0xff]  ;;  %v87_v10 = vld [vmem:[#allocation2 + $0x70] sm:$0xff] }
  0x22   :  { %v117_v2 = vmul.f32 %v100_v57, %v84_v56  ;;  %v102_v5 = vld [vmem:[#allocation4 + $0x68] sm:$0xff]  ;;  %v118_v7 = vmul.f32 %v101_v63, %v85_v62  ;;  %v103_v11 = vld [vmem:[#allocation4 + $0x70] sm:$0xff]  ;;  %v88_v15 = vld [vmem:[#allocation2 + $0x78] sm:$0xff] }
  0x23   :  { %v148_v35 = vadd.f32 %v147_v29, %v79_v26  ;;  %v125_v37 = vadd.f32 %v124_v31, %v110_v24  ;;  %v167_v40 = vadd.f32 %v166_v34, %v94_v22  ;;  %v119_v13 = vmul.f32 %v102_v5, %v86_v4  ;;  %v104_v16 = vld [vmem:[#allocation4 + $0x78] sm:$0xff]  ;;  %v105_v31 = vld [vmem:[%s498_s2] sm:$0xff] }
  0x24   :  { %v120_v18 = vmul.f32 %v103_v11, %v87_v10  ;;  %v121_v22 = vmul.f32 %v104_v16, %v88_v15 }
  0x25   :  { %v149_v41 = vadd.f32 %v148_v35, %v80_v32  ;;  %v126_v43 = vadd.f32 %v125_v37, %v111_v30  ;;  %v168_v46 = vadd.f32 %v167_v40, %v95_v27  ;;  %v162_v30 = vld [vmem:[%s500_s4] sm:$0xff] }
  0x27   :  { %v150_v47 = vadd.f32 %v149_v41, %v81_v38  ;;  %v127_v49 = vadd.f32 %v126_v43, %v112_v36  ;;  %v169_v52 = vadd.f32 %v168_v46, %v96_v33  ;;  %v142_v36 = vld [vmem:[%s499_s3] sm:$0xff] }
  0x29   :  { %v151_v53 = vadd.f32 %v150_v47, %v82_v44  ;;  %v128_v55 = vadd.f32 %v127_v49, %v113_v42  ;;  %v170_v58 = vadd.f32 %v169_v52, %v97_v39 }
  0x2b   :  { %v152_v59 = vadd.f32 %v151_v53, %v83_v50  ;;  %v129_v61 = vadd.f32 %v128_v55, %v114_v48  ;;  %v171_v0 = vadd.f32 %v170_v58, %v98_v45 }
  0x2d   :  { %v153_v1 = vadd.f32 %v152_v59, %v84_v56  ;;  %v130_v3 = vadd.f32 %v129_v61, %v115_v54  ;;  %v172_v6 = vadd.f32 %v171_v0, %v99_v51 }
  0x2f   :  { %v131_v8 = vadd.f32 %v130_v3, %v116_v60  ;;  %v154_v9 = vadd.f32 %v153_v1, %v85_v62  ;;  %v173_v12 = vadd.f32 %v172_v6, %v100_v57 }
  0x31   :  { %v132_v14 = vadd.f32 %v131_v8, %v117_v2  ;;  %v174_v17 = vadd.f32 %v173_v12, %v101_v63  ;;  %v155_v20 = vadd.f32 %v154_v9, %v86_v4 }
  0x33   :  { %v133_v19 = vadd.f32 %v132_v14, %v118_v7  ;;  %v175_v21 = vadd.f32 %v174_v17, %v102_v5  ;;  %v156_v26 = vadd.f32 %v155_v20, %v87_v10 }
  0x35   :  { %v134_v23 = vadd.f32 %v133_v19, %v119_v13  ;;  %v176_v24 = vadd.f32 %v175_v21, %v103_v11  ;;  %v157_v29 = vadd.f32 %v156_v26, %v88_v15 }
  0x37   :  { %v135_v25 = vadd.f32 %v134_v23, %v120_v18  ;;  %v177_v27 = vadd.f32 %v176_v24, %v104_v16 }
  0x39   :  { %v136_v28 = vadd.f32 %v135_v25, %v121_v22  ;;  %178 = vadd.xlane.f32.xlu1 %v177_v27 }
  0x3b   :  { %137 = vadd.xlane.f32.xlu0 %v136_v28 }
  0x3f   :  { %158 = vadd.xlane.f32.xlu0 %v157_v29 }
  0xc2   :  { %v179_v32 = vpop.xlane.xlu1 %178 }
  0xc3   :  { %v180_v34 = vadd.f32 %v179_v32, %v162_v30 }
  0xc4   :  { %v138_v33 = vpop.xlane.xlu0 %137 }
  0xc5   :  { %v139_v35 = vadd.f32 %v138_v33, %v105_v31  ;;  %181 = vst.msk [vmem:[%s500_s4] sm:$0xff] %vm62_vm0, %v180_v34 }
  0xc7   :  { %141 = vst.msk [vmem:[%s498_s2] sm:$0xff] %vm62_vm0, %v139_v35 }
  0xc8   :  { %v159_v37 = vpop.xlane.xlu0 %158 }
  0xc9   :  { %v160_v38 = vadd.f32 %v159_v37, %v142_v36 }
  0xcb   :  { %161 = vst.msk [vmem:[%s499_s3] sm:$0xff] %vm62_vm0, %v160_v38 }
  0xcc   :  { %376 = vsyncpa [#allocation3], 1 }
  0xcd   :  { %377 = vsyncpa [#allocation5], 1 }

</bundles_post_ra>
